<compile_context>
chip_gen: v6e
topology: v6e:2x2x1
jax: 0.10.0
libtpu: 0.0.40
codegen_flags: <defaults>
</compile_context>

<pallas_src>
import functools

import jax
import jax.numpy as jnp
from jax.experimental import pallas as pl
from jax.experimental.pallas import tpu as pltpu

MAX_LOGSTD = 10.0
LEAKY_SLOPE = 0.01            # nn.LeakyReLU default negative_slope
_MIB = 1024 * 1024
_P_RESIDENT_BYTES = 2 * _MIB  # keep P resident in VMEM if one copy fits this


def _round_up(x, m):
    return (x + m - 1) // m * m


def _pad_nodes(n):
    """Padded node count: 128-aligned; padded further only if it costs <=10% A bytes."""
    n128 = _round_up(max(n, 1), 128)
    for align in (2048, 1024, 512, 256):
        cand = _round_up(n, align)
        if 10 * cand * cand <= 11 * n128 * n128:
            return cand
    return n128


def _pick_tile(n_pad, cap):
    t = 128
    for cand in (256, 512, 1024, 2048):
        if cand <= cap and n_pad % cand == 0:
            t = cand
    return t


def _plan_tiles(n_pad):
    # Row axis is "parallel": keep >= 2 row blocks when possible (v7x has 2 TCs
    # that only get work via the parallel axis).  Source/reduction axis
    # ("arbitrary") uses the biggest block dividing n_pad, up to 2048, to sit
    # near the HBM roofline.
    cap_m = max(128, min(512, n_pad // 2))
    return _pick_tile(n_pad, cap_m), _pick_tile(n_pad, 2048)


def _layer1_kernel(a_ref, x_ref, w1_ref, b1_ref, wh_ref, o_ref, acc_ref, *,
                   tile_k, p_resident):
    """acc = A @ X; epilogue: out = (LeakyReLU(acc @ W1 + b1)) @ [Wmu|Wls] (bf16)."""
    k = pl.program_id(1)

    @pl.when(k == 0)
    def _init():
        acc_ref[...] = jnp.zeros_like(acc_ref)

    if p_resident:
        start = pl.multiple_of(k * tile_k, 128)
        p = x_ref[pl.ds(start, tile_k), :]
    else:
        p = x_ref[...]
    # Dominant O(N^2) propagation matmul: bf16 operands, fp32 accumulation.
    acc_ref[...] += jnp.dot(a_ref[...], p, preferred_element_type=jnp.float32)

    @pl.when(k == pl.num_programs(1) - 1)
    def _finalize():
        h = jnp.dot(acc_ref[...], w1_ref[...],
                    preferred_element_type=jnp.float32) + b1_ref[...]
        h = jnp.where(h > 0, h, LEAKY_SLOPE * h)   # LeakyReLU; Dropout(p=0) = id
        packed = jnp.dot(h, wh_ref[...], preferred_element_type=jnp.float32)
        o_ref[...] = packed.astype(o_ref.dtype)


def _heads_kernel(a_ref, p_ref, b_ref, o_ref, acc_ref, *, tile_k, p_resident,
                  clamp_from):
    """acc = A @ (h @ [Wmu|Wls]); epilogue: + [bmu|bls], clamp the logstd half."""
    k = pl.program_id(1)

    @pl.when(k == 0)
    def _init():
        acc_ref[...] = jnp.zeros_like(acc_ref)

    if p_resident:
        start = pl.multiple_of(k * tile_k, 128)
        p = p_ref[pl.ds(start, tile_k), :]
    else:
        p = p_ref[...]
    acc_ref[...] += jnp.dot(a_ref[...], p, preferred_element_type=jnp.float32)

    @pl.when(k == pl.num_programs(1) - 1)
    def _finalize():
        out = acc_ref[...] + b_ref[...]
        col = jax.lax.broadcasted_iota(jnp.int32, out.shape, 1)
        out = jnp.where(col >= clamp_from, jnp.minimum(out, MAX_LOGSTD), out)
        o_ref[...] = out.astype(o_ref.dtype)


def _propagate(kernel_fn, a, p, extras, fout, out_dtype, *, extra_flops=0,
               **kernel_kwargs):
    """Tiled pallas_call for out = epilogue(A @ P), A: [n_pad, n_pad] (bf16)."""
    n_pad = a.shape[0]
    fp = p.shape[1]
    tile_m, tile_k = _plan_tiles(n_pad)
    grid = (n_pad // tile_m, n_pad // tile_k)

    # Keep P fully VMEM-resident (fetched once) when small; otherwise it would
    # be re-fetched once per row tile.
    p_resident = (grid[0] > 1 and grid[1] > 1
                  and n_pad * fp * p.dtype.itemsize <= _P_RESIDENT_BYTES)

    kernel = functools.partial(kernel_fn, tile_k=tile_k,
                               p_resident=p_resident, **kernel_kwargs)

    a_spec = pl.BlockSpec((tile_m, tile_k), lambda i, k: (i, k))
    if p_resident:
        p_spec = pl.BlockSpec((n_pad, fp), lambda i, k: (0, 0))
    else:
        p_spec = pl.BlockSpec((tile_k, fp), lambda i, k: (k, 0))
    extra_specs = [pl.BlockSpec(e.shape, lambda i, k: (0, 0)) for e in extras]

    out_itemsize = jnp.dtype(out_dtype).itemsize
    a_bytes = int(a.size) * a.dtype.itemsize
    p_bytes = (1 if p_resident else grid[0]) * int(p.size) * p.dtype.itemsize
    extra_bytes = sum(int(e.size) * e.dtype.itemsize for e in extras)
    bytes_accessed = int(a_bytes + p_bytes + extra_bytes
                         + n_pad * fout * out_itemsize)
    flops = int(2 * n_pad * n_pad * fp + extra_flops)

    plan = (2 * tile_m * tile_k * a.dtype.itemsize             # A double-buffer
            + 2 * (n_pad if p_resident else tile_k) * fp * p.dtype.itemsize
            + 2 * tile_m * fout * out_itemsize                 # out double-buffer
            + tile_m * fp * 4                                  # fp32 accumulator
            + 2 * extra_bytes)
    vmem_limit = int(min(48 * _MIB, max(32 * _MIB, 2 * plan)))  # v7x-safe cap

    return pl.pallas_call(
        kernel,
        out_shape=jax.ShapeDtypeStruct((n_pad, fout), out_dtype),
        grid_spec=pltpu.PrefetchScalarGridSpec(
            num_scalar_prefetch=0,
            grid=grid,
            in_specs=[a_spec, p_spec] + extra_specs,
            out_specs=pl.BlockSpec((tile_m, fout), lambda i, k: (i, 0)),
            scratch_shapes=[pltpu.VMEM((tile_m, fp), jnp.float32)],
        ),
        compiler_params=pltpu.CompilerParams(
            dimension_semantics=("parallel", "arbitrary"),
            vmem_limit_bytes=vmem_limit,
        ),
        cost_estimate=pl.CostEstimate(flops=flops, transcendentals=0,
                                      bytes_accessed=bytes_accessed),
    )(a, p, *extras)


def dim_variational_encoder(x, a_pad, params):
    """Forward pass of DimVariationalEmcoder.

    x:     [N, feature_dim] float32 node features.
    a_pad: [n_pad, n_pad] pre-padded, pre-cast (bf16) normalized adjacency
           D^{-1/2}(A+I)D^{-1/2} from build_norm_adj() (built once per graph).
    Returns (mu, logstd), each [N, embd_dim] float32, logstd clamped at 10.
    """
    n = x.shape[0]
    n_pad = a_pad.shape[0]
    embd_dim = params["wmu"].shape[1]
    inter_dim = params["w1"].shape[1]

    # Only the tiny [N, F] feature matrix is padded/cast per call; the O(N^2)
    # adjacency is prepared once outside the forward (hoisted).
    xp = jnp.pad(x, ((0, n_pad - n), (0, 0))).astype(a_pad.dtype)

    # mu / logstd heads share one propagation: W_heads = [Wmu | Wls].
    w_heads = jnp.concatenate([params["wmu"], params["wls"]], axis=1)
    b_heads = jnp.concatenate([params["bmu"], params["bls"]], axis=1)

    # Layer 1 (+ fused head pre-multiply in the epilogue):
    #   P = (LeakyReLU(A @ X @ W1 + b1)) @ W_heads      -> bf16 [n_pad, 2*embd]
    p_heads = _propagate(
        _layer1_kernel, a_pad, xp,
        extras=[params["w1"], params["b1"], w_heads],
        fout=2 * embd_dim, out_dtype=jnp.bfloat16,
        extra_flops=(2 * n_pad * x.shape[1] * inter_dim
                     + 2 * n_pad * inter_dim * 2 * embd_dim))

    # Layer 2: [mu | logstd] = A @ P + [bmu | bls], clamp the logstd half.
    packed = _propagate(
        _heads_kernel, a_pad, p_heads,
        extras=[b_heads],
        fout=2 * embd_dim, out_dtype=jnp.float32,
        clamp_from=embd_dim)

    mu = packed[:n, :embd_dim]
    logstd = packed[:n, embd_dim:]
    return mu, logstd


def gcn_norm_adj(edge_index, num_nodes):
    """Dense GCN-normalized adjacency D^{-1/2}(A+I)D^{-1/2} (float32, unpadded).

    edge_index: [2, E] int32, row 0 = source, row 1 = target (PyG convention).
    Duplicate edges collapse to weight 1 (differs from PyG on multigraphs).
    """
    src, dst = edge_index[0], edge_index[1]
    a = jnp.zeros((num_nodes, num_nodes), jnp.float32).at[dst, src].set(1.0)
    a = a + jnp.eye(num_nodes, dtype=jnp.float32)
    deg = a.sum(axis=1)
    dinv = jnp.where(deg > 0, 1.0 / jnp.sqrt(deg), 0.0)
    return dinv[:, None] * a * dinv[None, :]


def build_norm_adj(edge_index, num_nodes, adj_dtype=jnp.bfloat16):
    """Kernel-ready adjacency: normalized, padded to the tile plan, cast to bf16.

    Build this ONCE per graph (outside the jitted forward): re-padding and
    re-casting the O(N^2) operand each call costs more HBM traffic than the
    kernel itself moves.
    """
    a = gcn_norm_adj(edge_index, num_nodes)
    n_pad = _pad_nodes(num_nodes)
    pad = n_pad - num_nodes
    return jnp.pad(a, ((0, pad), (0, pad))).astype(adj_dtype)


def glorot(key, shape):
    fan_in, fan_out = shape
    limit = jnp.sqrt(6.0 / (fan_in + fan_out))
    return jax.random.uniform(key, shape, jnp.float32, -limit, limit)


def init_params(key, feature_dim, inter_dim, embd_dim):
    k1, k2, k3 = jax.random.split(key, 3)
    return {
        "w1": glorot(k1, (feature_dim, inter_dim)),
        "b1": jnp.zeros((1, inter_dim), jnp.float32),
        "wmu": glorot(k2, (inter_dim, embd_dim)),
        "bmu": jnp.zeros((1, embd_dim), jnp.float32),
        "wls": glorot(k3, (inter_dim, embd_dim)),
        "bls": jnp.zeros((1, embd_dim), jnp.float32),
    }


def _reference(x, a_hat, params):
    """Pure-JAX fp32 reference of the forward pass."""
    h = a_hat @ (x @ params["w1"]) + params["b1"]
    h = jnp.where(h > 0, h, LEAKY_SLOPE * h)
    mu = a_hat @ (h @ params["wmu"]) + params["bmu"]
    ls = a_hat @ (h @ params["wls"]) + params["bls"]
    return mu, jnp.minimum(ls, MAX_LOGSTD)


if __name__ == "__main__":
    # Small graph: 16 nodes, 32 directed edges.
    feature_dim, inter_dim, embd_dim = 16, 32, 8
    num_nodes, num_edges = 16, 32

    key = jax.random.PRNGKey(0)
    kx, ke, kp = jax.random.split(key, 3)

    x = jax.random.normal(kx, (num_nodes, feature_dim), jnp.float32)
    edge_index = jax.random.randint(ke, (2, num_edges), 0, num_nodes, jnp.int32)
    params = init_params(kp, feature_dim, inter_dim, embd_dim)

    a_hat = gcn_norm_adj(edge_index, num_nodes)      # f32, unpadded (reference)
    a_pad = build_norm_adj(edge_index, num_nodes)    # padded bf16, hoisted prep

    mu, logstd = jax.jit(dim_variational_encoder)(x, a_pad, params)
    jax.block_until_ready((mu, logstd))

    assert mu.shape == (num_nodes, embd_dim)
    assert logstd.shape == (num_nodes, embd_dim)
    assert bool(jnp.all(logstd <= MAX_LOGSTD))

    # Validate against the pure-JAX fp32 reference (bf16 A / P => loose tol).
    mu_ref, ls_ref = _reference(x, a_hat, params)
    assert bool(jnp.allclose(mu, mu_ref, atol=5e-2, rtol=5e-2)), (
        float(jnp.max(jnp.abs(mu - mu_ref))))
    assert bool(jnp.allclose(logstd, ls_ref, atol=5e-2, rtol=5e-2)), (
        float(jnp.max(jnp.abs(logstd - ls_ref))))

    # TODO(synk): encode() (reparameterization with torch.randn_like) is not
    # part of forward(); it is intentionally not included in the kernel.
    print("KERNEL_OK")
</pallas_src>

<mosaic_0001>
module attributes {stable_mosaic.version = 11 : i64} {
  func.func @_heads_kernel(%arg0: i32, %arg1: i32, %arg2: memref<128x128xbf16, #tpu.memory_space<vmem>>, %arg3: memref<128x16xbf16, #tpu.memory_space<vmem>>, %arg4: memref<1x16xf32, #tpu.memory_space<vmem>>, %arg5: memref<128x16xf32, #tpu.memory_space<vmem>>, %arg6: memref<128x16xf32, #tpu.memory_space<vmem>>) attributes {dimension_semantics = [#tpu.dimension_semantics<parallel>, #tpu.dimension_semantics<arbitrary>], iteration_bounds = array<i64: 1, 1>, scalar_prefetch = 0 : i64, scratch_operands = 1 : i64, tpu.core_type = #tpu.core_type<tc>, window_params = [{transform_indices = @transform_0, window_bounds = array<i64: 128, 128>}, {transform_indices = @transform_1, window_bounds = array<i64: 128, 16>}, {pipeline_mode = #tpu.pipeline_mode<synchronous>, transform_indices = @transform_2, window_bounds = array<i64: 1, 16>}, {transform_indices = @transform_3, window_bounds = array<i64: 128, 16>}]} {
    %c0_i32 = arith.constant 0 : i32
    %0 = arith.cmpi eq, %arg1, %c0_i32 : i32
    %1 = arith.extui %0 : i1 to i32
    %c0_i32_0 = arith.constant 0 : i32
    %2 = arith.cmpi ne, %1, %c0_i32_0 : i32
    scf.if %2 {
      %cst_10 = arith.constant 0.000000e+00 : f32
      %12 = vector.broadcast %cst_10 : f32 to vector<128x16xf32>
      %c0_11 = arith.constant 0 : index
      %c0_12 = arith.constant 0 : index
      %13 = vector.load %arg6[%c0_11, %c0_12] : memref<128x16xf32, #tpu.memory_space<vmem>>, vector<128x16xf32>
      tpu.vector_store %arg6[%c0_11, %c0_12], %12 {strides = array<i32>} : memref<128x16xf32, #tpu.memory_space<vmem>>, vector<128x16xf32>,
    } else {
    }
    %c0 = arith.constant 0 : index
    %c0_1 = arith.constant 0 : index
    %3 = vector.load %arg3[%c0, %c0_1] : memref<128x16xbf16, #tpu.memory_space<vmem>>, vector<128x16xbf16>
    %c0_2 = arith.constant 0 : index
    %c0_3 = arith.constant 0 : index
    %4 = vector.load %arg6[%c0_2, %c0_3] : memref<128x16xf32, #tpu.memory_space<vmem>>, vector<128x16xf32>
    %c0_4 = arith.constant 0 : index
    %c0_5 = arith.constant 0 : index
    %5 = vector.load %arg2[%c0_4, %c0_5] : memref<128x128xbf16, #tpu.memory_space<vmem>>, vector<128x128xbf16>
    %cst = arith.constant dense<0.000000e+00> : vector<128x16xf32>
    %6 = tpu.matmul %5, %3, %cst {dimension_numbers = #tpu.dot_dimension_numbers<[1], [0], [0], [1], [0, 0, 1, 1], [], []>} : vector<128x128xbf16>, vector<128x16xbf16>, vector<128x16xf32> -> vector<128x16xf32>
    %7 = arith.addf %4, %6 : vector<128x16xf32>
    %c0_6 = arith.constant 0 : index
    %c0_7 = arith.constant 0 : index
    %8 = vector.load %arg6[%c0_6, %c0_7] : memref<128x16xf32, #tpu.memory_space<vmem>>, vector<128x16xf32>
    tpu.vector_store %arg6[%c0_6, %c0_7], %7 {strides = array<i32>} : memref<128x16xf32, #tpu.memory_space<vmem>>, vector<128x16xf32>,
    %c0_i32_8 = arith.constant 0 : i32
    %9 = arith.cmpi eq, %arg1, %c0_i32_8 : i32
    %10 = arith.extui %9 : i1 to i32
    %c0_i32_9 = arith.constant 0 : i32
    %11 = arith.cmpi ne, %10, %c0_i32_9 : i32
    scf.if %11 {
      %c0_10 = arith.constant 0 : index
      %c0_11 = arith.constant 0 : index
      %12 = vector.load %arg6[%c0_10, %c0_11] : memref<128x16xf32, #tpu.memory_space<vmem>>, vector<128x16xf32>
      %c0_12 = arith.constant 0 : index
      %c0_13 = arith.constant 0 : index
      %13 = vector.load %arg4[%c0_12, %c0_13] : memref<1x16xf32, #tpu.memory_space<vmem>>, vector<1x16xf32>
      %14 = vector.broadcast %13 : vector<1x16xf32> to vector<128x16xf32>
      %15 = arith.addf %12, %14 : vector<128x16xf32>
      %16 = tpu.iota {dimensions = array<i32: 1>} : vector<128x16xi32>
      %c8_i32 = arith.constant 8 : i32
      %17 = vector.broadcast %c8_i32 : i32 to vector<128x16xi32>
      %18 = arith.cmpi sge, %16, %17 : vector<128x16xi32>
      %cst_14 = arith.constant 1.000000e+01 : f32
      %19 = vector.broadcast %cst_14 : f32 to vector<128x16xf32>
      %20 = arith.minimumf %15, %19 : vector<128x16xf32>
      %21 = arith.select %18, %20, %15 : vector<128x16xi1>, vector<128x16xf32>
      %c0_15 = arith.constant 0 : index
      %c0_16 = arith.constant 0 : index
      %22 = vector.load %arg5[%c0_15, %c0_16] : memref<128x16xf32, #tpu.memory_space<vmem>>, vector<128x16xf32>
      tpu.vector_store %arg5[%c0_15, %c0_16], %21 {strides = array<i32>} : memref<128x16xf32, #tpu.memory_space<vmem>>, vector<128x16xf32>,
    } else {
    }
    return
  }
  func.func @transform_0(%arg0: i32, %arg1: i32) -> (i32, i32) {
    %c0_i32 = arith.constant 0 : i32
    return %arg0, %arg1 : i32, i32
  }
  func.func @transform_1(%arg0: i32, %arg1: i32) -> (i32, i32) {
    %c0_i32 = arith.constant 0 : i32
    %c0_i32_0 = arith.constant 0 : i32
    return %arg1, %c0_i32 : i32, i32
  }
  func.func @transform_2(%arg0: i32, %arg1: i32) -> (i32, i32) {
    %c0_i32 = arith.constant 0 : i32
    %c0_i32_0 = arith.constant 0 : i32
    %c0_i32_1 = arith.constant 0 : i32
    return %c0_i32, %c0_i32_0 : i32, i32
  }
  func.func @transform_3(%arg0: i32, %arg1: i32) -> (i32, i32) {
    %c0_i32 = arith.constant 0 : i32
    %c0_i32_0 = arith.constant 0 : i32
    return %arg0, %c0_i32 : i32, i32
  }
}

module attributes {stable_mosaic.version = 11 : i64} {
  func.func @_layer1_kernel(%arg0: i32, %arg1: i32, %arg2: memref<128x128xbf16, #tpu.memory_space<vmem>>, %arg3: memref<128x16xbf16, #tpu.memory_space<vmem>>, %arg4: memref<16x32xf32, #tpu.memory_space<vmem>>, %arg5: memref<1x32xf32, #tpu.memory_space<vmem>>, %arg6: memref<32x16xf32, #tpu.memory_space<vmem>>, %arg7: memref<128x16xbf16, #tpu.memory_space<vmem>>, %arg8: memref<128x16xf32, #tpu.memory_space<vmem>>) attributes {dimension_semantics = [#tpu.dimension_semantics<parallel>, #tpu.dimension_semantics<arbitrary>], iteration_bounds = array<i64: 1, 1>, scalar_prefetch = 0 : i64, scratch_operands = 1 : i64, tpu.core_type = #tpu.core_type<tc>, window_params = [{transform_indices = @transform_0, window_bounds = array<i64: 128, 128>}, {transform_indices = @transform_1, window_bounds = array<i64: 128, 16>}, {pipeline_mode = #tpu.pipeline_mode<synchronous>, transform_indices = @transform_2, window_bounds = array<i64: 16, 32>}, {pipeline_mode = #tpu.pipeline_mode<synchronous>, transform_indices = @transform_3, window_bounds = array<i64: 1, 32>}, {pipeline_mode = #tpu.pipeline_mode<synchronous>, transform_indices = @transform_4, window_bounds = array<i64: 32, 16>}, {transform_indices = @transform_5, window_bounds = array<i64: 128, 16>}]} {
    %c0_i32 = arith.constant 0 : i32
    %0 = arith.cmpi eq, %arg1, %c0_i32 : i32
    %1 = arith.extui %0 : i1 to i32
    %c0_i32_0 = arith.constant 0 : i32
    %2 = arith.cmpi ne, %1, %c0_i32_0 : i32
    scf.if %2 {
      %cst_10 = arith.constant 0.000000e+00 : f32
      %12 = vector.broadcast %cst_10 : f32 to vector<128x16xf32>
      %c0_11 = arith.constant 0 : index
      %c0_12 = arith.constant 0 : index
      %13 = vector.load %arg8[%c0_11, %c0_12] : memref<128x16xf32, #tpu.memory_space<vmem>>, vector<128x16xf32>
      tpu.vector_store %arg8[%c0_11, %c0_12], %12 {strides = array<i32>} : memref<128x16xf32, #tpu.memory_space<vmem>>, vector<128x16xf32>,
    } else {
    }
    %c0 = arith.constant 0 : index
    %c0_1 = arith.constant 0 : index
    %3 = vector.load %arg3[%c0, %c0_1] : memref<128x16xbf16, #tpu.memory_space<vmem>>, vector<128x16xbf16>
    %c0_2 = arith.constant 0 : index
    %c0_3 = arith.constant 0 : index
    %4 = vector.load %arg8[%c0_2, %c0_3] : memref<128x16xf32, #tpu.memory_space<vmem>>, vector<128x16xf32>
    %c0_4 = arith.constant 0 : index
    %c0_5 = arith.constant 0 : index
    %5 = vector.load %arg2[%c0_4, %c0_5] : memref<128x128xbf16, #tpu.memory_space<vmem>>, vector<128x128xbf16>
    %cst = arith.constant dense<0.000000e+00> : vector<128x16xf32>
    %6 = tpu.matmul %5, %3, %cst {dimension_numbers = #tpu.dot_dimension_numbers<[1], [0], [0], [1], [0, 0, 1, 1], [], []>} : vector<128x128xbf16>, vector<128x16xbf16>, vector<128x16xf32> -> vector<128x16xf32>
    %7 = arith.addf %4, %6 : vector<128x16xf32>
    %c0_6 = arith.constant 0 : index
    %c0_7 = arith.constant 0 : index
    %8 = vector.load %arg8[%c0_6, %c0_7] : memref<128x16xf32, #tpu.memory_space<vmem>>, vector<128x16xf32>
    tpu.vector_store %arg8[%c0_6, %c0_7], %7 {strides = array<i32>} : memref<128x16xf32, #tpu.memory_space<vmem>>, vector<128x16xf32>,
    %c0_i32_8 = arith.constant 0 : i32
    %9 = arith.cmpi eq, %arg1, %c0_i32_8 : i32
    %10 = arith.extui %9 : i1 to i32
    %c0_i32_9 = arith.constant 0 : i32
    %11 = arith.cmpi ne, %10, %c0_i32_9 : i32
    scf.if %11 {
      %c0_10 = arith.constant 0 : index
      %c0_11 = arith.constant 0 : index
      %12 = vector.load %arg8[%c0_10, %c0_11] : memref<128x16xf32, #tpu.memory_space<vmem>>, vector<128x16xf32>
      %c0_12 = arith.constant 0 : index
      %c0_13 = arith.constant 0 : index
      %13 = vector.load %arg4[%c0_12, %c0_13] : memref<16x32xf32, #tpu.memory_space<vmem>>, vector<16x32xf32>
      %cst_14 = arith.constant dense<0.000000e+00> : vector<128x32xf32>
      %14 = tpu.matmul %12, %13, %cst_14 {dimension_numbers = #tpu.dot_dimension_numbers<[1], [0], [0], [1], [0, 0, 1, 1], [], []>} : vector<128x16xf32>, vector<16x32xf32>, vector<128x32xf32> -> vector<128x32xf32>
      %c0_15 = arith.constant 0 : index
      %c0_16 = arith.constant 0 : index
      %15 = vector.load %arg5[%c0_15, %c0_16] : memref<1x32xf32, #tpu.memory_space<vmem>>, vector<1x32xf32>
      %16 = vector.broadcast %15 : vector<1x32xf32> to vector<128x32xf32>
      %17 = arith.addf %14, %16 : vector<128x32xf32>
      %cst_17 = arith.constant 0.000000e+00 : f32
      %18 = vector.broadcast %cst_17 : f32 to vector<128x32xf32>
      %19 = arith.cmpf ogt, %17, %18 : vector<128x32xf32>
      %cst_18 = arith.constant 0.00999999977 : f32
      %20 = vector.broadcast %cst_18 : f32 to vector<128x32xf32>
      %21 = arith.mulf %20, %17 : vector<128x32xf32>
      %22 = arith.select %19, %17, %21 : vector<128x32xi1>, vector<128x32xf32>
      %c0_19 = arith.constant 0 : index
      %c0_20 = arith.constant 0 : index
      %23 = vector.load %arg6[%c0_19, %c0_20] : memref<32x16xf32, #tpu.memory_space<vmem>>, vector<32x16xf32>
      %cst_21 = arith.constant dense<0.000000e+00> : vector<128x16xf32>
      %24 = tpu.matmul %22, %23, %cst_21 {dimension_numbers = #tpu.dot_dimension_numbers<[1], [0], [0], [1], [0, 0, 1, 1], [], []>} : vector<128x32xf32>, vector<32x16xf32>, vector<128x16xf32> -> vector<128x16xf32>
      %25 = arith.truncf %24 : vector<128x16xf32> to vector<128x16xbf16>
      %c0_22 = arith.constant 0 : index
      %c0_23 = arith.constant 0 : index
      %26 = vector.load %arg7[%c0_22, %c0_23] : memref<128x16xbf16, #tpu.memory_space<vmem>>, vector<128x16xbf16>
      tpu.vector_store %arg7[%c0_22, %c0_23], %25 {strides = array<i32>} : memref<128x16xbf16, #tpu.memory_space<vmem>>, vector<128x16xbf16>,
    } else {
    }
    return
  }
  func.func @transform_0(%arg0: i32, %arg1: i32) -> (i32, i32) {
    %c0_i32 = arith.constant 0 : i32
    return %arg0, %arg1 : i32, i32
  }
  func.func @transform_1(%arg0: i32, %arg1: i32) -> (i32, i32) {
    %c0_i32 = arith.constant 0 : i32
    %c0_i32_0 = arith.constant 0 : i32
    return %arg1, %c0_i32 : i32, i32
  }
  func.func @transform_2(%arg0: i32, %arg1: i32) -> (i32, i32) {
    %c0_i32 = arith.constant 0 : i32
    %c0_i32_0 = arith.constant 0 : i32
    %c0_i32_1 = arith.constant 0 : i32
    return %c0_i32, %c0_i32_0 : i32, i32
  }
  func.func @transform_3(%arg0: i32, %arg1: i32) -> (i32, i32) {
    %c0_i32 = arith.constant 0 : i32
    %c0_i32_0 = arith.constant 0 : i32
    %c0_i32_1 = arith.constant 0 : i32
    return %c0_i32, %c0_i32_0 : i32, i32
  }
  func.func @transform_4(%arg0: i32, %arg1: i32) -> (i32, i32) {
    %c0_i32 = arith.constant 0 : i32
    %c0_i32_0 = arith.constant 0 : i32
    %c0_i32_1 = arith.constant 0 : i32
    return %c0_i32, %c0_i32_0 : i32, i32
  }
  func.func @transform_5(%arg0: i32, %arg1: i32) -> (i32, i32) {
    %c0_i32 = arith.constant 0 : i32
    %c0_i32_0 = arith.constant 0 : i32
    return %arg0, %c0_i32 : i32, i32
  }
}

</mosaic_0001>

<bundles_post_ra>
// kernel: dim_variational_encoder.3
= control target key start
LH: loop header
LB: loop body
LE: loop exit
PB: predicated region body
PF: predicated region fallthrough
CT: control target
= control target key end

     0   :  { %vm19_vm0 = vcmask 130048   ;;  %v505_v1 = vmov 0.0   ;;  %v352_v31 = vlaneseq  ;;  %s726_s1 = inlined_call_operand.vmem [shape: bf16[128,16], index: 1, kind: input, shape index: {}]   ;;  %s727_s0 = inlined_call_operand.vmem [shape: bf16[128,128], index: 0, kind: input, shape index: {}]   ;;  %s728_s2 = inlined_call_operand.vmem [shape: f32[1,16], index: 2, kind: input, shape index: {}]   ;;  %s729_s3 = inlined_call_operand.vmem [shape: f32[128,16], index: 3, kind: output, shape index: {}]  }
   0x1   :  { %v489_v0 = vld [vmem:[%s726_s1 + $0x38] sm:$0xff]   ;;  %22 = vst.msk [vmem:[#allocation2 + $0x10] sm:$0xff] %vm19_vm0, %v505_v1  ;;  %20 = vst.msk [vmem:[#allocation2] sm:$0xff] %vm19_vm0, %v505_v1  ;;  %v490_v2 = vld [vmem:[%s726_s1 + $0x30] sm:$0xff]  }
   0x2   :  { %21 = vst.msk [vmem:[#allocation2 + $0x8] sm:$0xff] %vm19_vm0, %v505_v1  ;;  %23 = vst.msk [vmem:[#allocation2 + $0x18] sm:$0xff] %vm19_vm0, %v505_v1  ;;  %440 = vmatprep.subr.bf16.mxu0 %v489_v0  ;;  %472 = vmatprep.subr.bf16.mxu1 %v489_v0  ;;  %v491_v3 = vld [vmem:[%s726_s1 + $0x28] sm:$0xff]   ;;  %v492_v4 = vld [vmem:[%s726_s1 + $0x20] sm:$0xff]   ;;  %v601_v45 = vand.u32 127, %v352_v31 }
   0x3   :  { %24 = vst.msk [vmem:[#allocation2 + $0x20] sm:$0xff] %vm19_vm0, %v505_v1  ;;  %25 = vst.msk [vmem:[#allocation2 + $0x28] sm:$0xff] %vm19_vm0, %v505_v1  ;;  %441 = vmatpush3.bf16.msra.mxu0 %v489_v0  ;;  %480 = vmatpush3.bf16.msra.mxu1 %v489_v0  ;;  %v497_v5 = vld [vmem:[%s727_s0] sm:$0xff]   ;;  %v493_v7 = vld [vmem:[%s726_s1 + $0x18] sm:$0xff]  }
   0x4   :  { %26 = vst.msk [vmem:[#allocation2 + $0x30] sm:$0xff] %vm19_vm0, %v505_v1  ;;  %27 = vst.msk [vmem:[#allocation2 + $0x38] sm:$0xff] %vm19_vm0, %v505_v1  ;;  %442 = vmatprep.subr.bf16.mxu0 %v490_v2  ;;  %473 = vmatprep.subr.bf16.mxu1 %v490_v2  ;;  %v498_v6 = vld [vmem:[%s727_s0 + $0x20] sm:$0xff]   ;;  %v494_v8 = vld [vmem:[%s726_s1 + $0x10] sm:$0xff]   ;;  %vm354_vm1 = vcmp.ge.s32.totalorder %v601_v45, 8 }
   0x5   :  { %28 = vst.msk [vmem:[#allocation2 + $0x40] sm:$0xff] %vm19_vm0, %v505_v1  ;;  %29 = vst.msk [vmem:[#allocation2 + $0x48] sm:$0xff] %vm19_vm0, %v505_v1  ;;  %456 = vmatprep.mubr.bf16.mxu0 %v497_v5  ;;  %464 = vmatprep.mubr.bf16.mxu1 %v498_v6  ;;  %v495_v9 = vld [vmem:[%s726_s1 + $0x8] sm:$0xff]   ;;  %v496_v10 = vld [vmem:[%s726_s1] sm:$0xff]  }
   0x6   :  { %30 = vst.msk [vmem:[#allocation2 + $0x50] sm:$0xff] %vm19_vm0, %v505_v1  ;;  %31 = vst.msk [vmem:[#allocation2 + $0x58] sm:$0xff] %vm19_vm0, %v505_v1  ;;  %v499_v11 = vld [vmem:[%s727_s0 + $0x8] sm:$0xff]   ;;  %v501_v13 = vld [vmem:[%s727_s0 + $0x10] sm:$0xff]  }
   0x7   :  { %32 = vst.msk [vmem:[#allocation2 + $0x60] sm:$0xff] %vm19_vm0, %v505_v1  ;;  %33 = vst.msk [vmem:[#allocation2 + $0x68] sm:$0xff] %vm19_vm0, %v505_v1  ;;  %443 = vmatpush3.bf16.msra.mxu0 %v490_v2  ;;  %481 = vmatpush3.bf16.msra.mxu1 %v490_v2  ;;  %v500_v12 = vld [vmem:[%s727_s0 + $0x28] sm:$0xff]   ;;  %v502_v14 = vld [vmem:[%s727_s0 + $0x30] sm:$0xff]  }
   0x8   :  { %34 = vst.msk [vmem:[#allocation2 + $0x70] sm:$0xff] %vm19_vm0, %v505_v1  ;;  %35 = vst.msk [vmem:[#allocation2 + $0x78] sm:$0xff] %vm19_vm0, %v505_v1  ;;  %444 = vmatprep.subr.bf16.mxu0 %v491_v3  ;;  %474 = vmatprep.subr.bf16.mxu1 %v491_v3  ;;  %v503_v15 = vld [vmem:[%s727_s0 + $0x18] sm:$0xff]   ;;  %v54_v17 = vld [vmem:[#allocation2 + $0x10] sm:$0xff] }
   0x9   :  { %v504_v16 = vld [vmem:[%s727_s0 + $0x38] sm:$0xff]   ;;  %v52_v21 = vld [vmem:[#allocation2] sm:$0xff]  ;;  %v53_v34 = vld [vmem:[#allocation2 + $0x8] sm:$0xff] }
   0xa   :  { %v55_v27 = vld [vmem:[#allocation2 + $0x18] sm:$0xff]  ;;  %v599_v44 = vld [vmem:[%s728_s2] ss:$0 sm:$0xff]  ;;  %v57_v6 = vld [vmem:[#allocation2 + $0x28] sm:$0xff] }
   0xb   :  { %445 = vmatpush3.bf16.msra.mxu0 %v491_v3  ;;  %482 = vmatpush3.bf16.msra.mxu1 %v491_v3  ;;  %v58_v40 = vld [vmem:[#allocation2 + $0x30] sm:$0xff]  ;;  %v56_v48 = vld [vmem:[#allocation2 + $0x20] sm:$0xff]  ;;  %v59_v60 = vld [vmem:[#allocation2 + $0x38] sm:$0xff] }
   0xc   :  { %446 = vmatprep.subr.bf16.mxu0 %v492_v4  ;;  %475 = vmatprep.subr.bf16.mxu1 %v492_v4  ;;  %v60_v22 = vld [vmem:[#allocation2 + $0x40] sm:$0xff]  ;;  %v61_v35 = vld [vmem:[#allocation2 + $0x48] sm:$0xff] }
   0xd   :  { %v62_v18 = vld [vmem:[#allocation2 + $0x50] sm:$0xff]  ;;  %v63_v28 = vld [vmem:[#allocation2 + $0x58] sm:$0xff] }
   0xe   :  { %v64_v49 = vld [vmem:[#allocation2 + $0x60] sm:$0xff] }
   0xf   :  { %447 = vmatpush3.bf16.msra.mxu0 %v492_v4  ;;  %483 = vmatpush3.bf16.msra.mxu1 %v492_v4  ;;  %v66_v41 = vld [vmem:[#allocation2 + $0x70] sm:$0xff]  ;;  %v67_v61 = vld [vmem:[#allocation2 + $0x78] sm:$0xff] }
  0x10   :  { %448 = vmatprep.subr.bf16.mxu0 %v493_v7  ;;  %476 = vmatprep.subr.bf16.mxu1 %v493_v7 }
  0x13   :  { %449 = vmatpush3.bf16.msra.mxu0 %v493_v7  ;;  %484 = vmatpush3.bf16.msra.mxu1 %v493_v7  ;;  %v65_v7 = vld [vmem:[#allocation2 + $0x68] sm:$0xff] }
  0x14   :  { %450 = vmatprep.subr.bf16.mxu0 %v494_v8  ;;  %477 = vmatprep.subr.bf16.mxu1 %v494_v8 }
  0x17   :  { %451 = vmatpush3.bf16.msra.mxu0 %v494_v8  ;;  %485 = vmatpush3.bf16.msra.mxu1 %v494_v8 }
  0x18   :  { %452 = vmatprep.subr.bf16.mxu0 %v495_v9  ;;  %478 = vmatprep.subr.bf16.mxu1 %v495_v9 }
  0x1b   :  { %453 = vmatpush3.bf16.msra.mxu0 %v495_v9  ;;  %486 = vmatpush3.bf16.msra.mxu1 %v495_v9 }
  0x1c   :  { %454 = vmatprep.subr.bf16.mxu0 %v496_v10  ;;  %479 = vmatprep.subr.bf16.mxu1 %v496_v10 }
  0x1f   :  { %455 = vmatpush3.bf16.msra.mxu0 %v496_v10  ;;  %487 = vmatpush3.bf16.msra.mxu1 %v496_v10 }
  0x22   :  { %457 = vmatmul.mubr.bf16.vlgmr.msra.gmra.mxu0 %v499_v11  ;;  %465 = vmatmul.mubr.bf16.vlgmr.msra.gmra.mxu1 %v500_v12 }
  0x23   :  { %460 = vmatprep.mubr.bf16.mxu0 %v501_v13  ;;  %468 = vmatprep.mubr.bf16.mxu1 %v502_v14 }
  0x2a   :  { %461 = vmatmul.mubr.bf16.gmra.mxu0 %v503_v15  ;;  %469 = vmatmul.mubr.bf16.gmra.mxu1 %v504_v16 }
  0xe2   :  { %v458_v19 = vpop.f32.mrf.mxu0  ;;  %v466_v20 = vpop.f32.mrf.mxu1 }
  0xe3   :  { %v279_v23 = vadd.f32 %v458_v19, %v54_v17  ;;  %v287_v24 = vadd.f32 %v466_v20, %v62_v18 }
  0xe4   :  { %v214_v25 = vpop.f32.mrf.mxu0  ;;  %v246_v26 = vpop.f32.mrf.mxu1 }
  0xe5   :  { %296 = vst.msk [vmem:[#allocation2 + $0x10] sm:$0xff] %vm19_vm0, %v279_v23  ;;  %304 = vst.msk [vmem:[#allocation2 + $0x50] sm:$0xff] %vm19_vm0, %v287_v24  ;;  %v277_v29 = vadd.f32 %v214_v25, %v52_v21  ;;  %v285_v30 = vadd.f32 %v246_v26, %v60_v22 }
  0xe6   :  { %v459_v32 = vpop.f32.mrf.mxu0  ;;  %v467_v33 = vpop.f32.mrf.mxu1 }
  0xe7   :  { %294 = vst.msk [vmem:[#allocation2] sm:$0xff] %vm19_vm0, %v277_v29  ;;  %302 = vst.msk [vmem:[#allocation2 + $0x40] sm:$0xff] %vm19_vm0, %v285_v30  ;;  %v280_v36 = vadd.f32 %v459_v32, %v55_v27  ;;  %v288_v37 = vadd.f32 %v467_v33, %v63_v28 }
  0xe8   :  { %v217_v38 = vpop.f32.mrf.mxu0  ;;  %v249_v39 = vpop.f32.mrf.mxu1 }
  0xe9   :  { %297 = vst.msk [vmem:[#allocation2 + $0x18] sm:$0xff] %vm19_vm0, %v280_v36  ;;  %305 = vst.msk [vmem:[#allocation2 + $0x58] sm:$0xff] %vm19_vm0, %v288_v37  ;;  %v278_v42 = vadd.f32 %v217_v38, %v53_v34  ;;  %v286_v43 = vadd.f32 %v249_v39, %v61_v35 }
  0xea   :  { %v462_v46 = vpop.f32.mrf.mxu0  ;;  %v470_v47 = vpop.f32.mrf.mxu1 }
  0xeb   :  { %295 = vst.msk [vmem:[#allocation2 + $0x8] sm:$0xff] %vm19_vm0, %v278_v42  ;;  %303 = vst.msk [vmem:[#allocation2 + $0x48] sm:$0xff] %vm19_vm0, %v286_v43  ;;  %v283_v50 = vadd.f32 %v462_v46, %v58_v40  ;;  %v291_v51 = vadd.f32 %v470_v47, %v66_v41 }
  0xec   :  { %v315_v52 = vld [vmem:[#allocation2 + $0x10] sm:$0xff]  ;;  %v230_v54 = vpop.f32.mrf.mxu0  ;;  %v262_v55 = vpop.f32.mrf.mxu1 }
  0xed   :  { %v323_v53 = vld [vmem:[#allocation2 + $0x50] sm:$0xff]  ;;  %v338_v56 = vadd.f32 %v599_v44, %v315_v52  ;;  %300 = vst.msk [vmem:[#allocation2 + $0x30] sm:$0xff] %vm19_vm0, %v283_v50  ;;  %308 = vst.msk [vmem:[#allocation2 + $0x70] sm:$0xff] %vm19_vm0, %v291_v51  ;;  %v281_v58 = vadd.f32 %v230_v54, %v56_v48  ;;  %v289_v59 = vadd.f32 %v262_v55, %v64_v49 }
  0xee   :  { %v346_v57 = vadd.f32 %v599_v44, %v323_v53  ;;  %v313_v62 = vld [vmem:[#allocation2] sm:$0xff]  ;;  %v463_v0 = vpop.f32.mrf.mxu0  ;;  %v471_v1 = vpop.f32.mrf.mxu1 }
  0xef   :  { %v321_v63 = vld [vmem:[#allocation2 + $0x40] sm:$0xff]  ;;  %v357_v2 = vmin.f32 %v338_v56, 10.0  ;;  %v336_v4 = vadd.f32 %v599_v44, %v313_v62  ;;  %298 = vst.msk [vmem:[#allocation2 + $0x20] sm:$0xff] %vm19_vm0, %v281_v58  ;;  %306 = vst.msk [vmem:[#allocation2 + $0x60] sm:$0xff] %vm19_vm0, %v289_v59  ;;  %v284_v10 = vadd.f32 %v463_v0, %v59_v60  ;;  %v292_v11 = vadd.f32 %v471_v1, %v67_v61 }
  0xf0   :  { %v365_v3 = vmin.f32 %v346_v57, 10.0  ;;  %v344_v5 = vadd.f32 %v599_v44, %v321_v63  ;;  %v316_v8 = vld [vmem:[#allocation2 + $0x18] sm:$0xff]  ;;  %v233_v12 = vpop.f32.mrf.mxu0  ;;  %v265_v13 = vpop.f32.mrf.mxu1 }
  0xf1   :  { %v324_v9 = vld [vmem:[#allocation2 + $0x58] sm:$0xff]  ;;  %v373_v14 = vsel %vm354_vm1, %v357_v2, %v338_v56  ;;  %v355_v16 = vmin.f32 %v336_v4, 10.0  ;;  %v339_v18 = vadd.f32 %v599_v44, %v316_v8  ;;  %301 = vst.msk [vmem:[#allocation2 + $0x38] sm:$0xff] %vm19_vm0, %v284_v10  ;;  %309 = vst.msk [vmem:[#allocation2 + $0x78] sm:$0xff] %vm19_vm0, %v292_v11  ;;  %v282_v22 = vadd.f32 %v233_v12, %v57_v6 }
  0xf2   :  { %v381_v15 = vsel %vm354_vm1, %v365_v3, %v346_v57  ;;  %v363_v17 = vmin.f32 %v344_v5, 10.0  ;;  %389 = vst.msk [vmem:[%s729_s3 + $0x10] sm:$0xff] %vm19_vm0, %v373_v14  ;;  %v347_v19 = vadd.f32 %v599_v44, %v324_v9  ;;  %v314_v20 = vld [vmem:[#allocation2 + $0x8] sm:$0xff]  ;;  %v290_v23 = vadd.f32 %v265_v13, %v65_v7 }
  0xf3   :  { %397 = vst.msk [vmem:[%s729_s3 + $0x50] sm:$0xff] %vm19_vm0, %v381_v15  ;;  %v322_v21 = vld [vmem:[#allocation2 + $0x48] sm:$0xff]  ;;  %v371_v24 = vsel %vm354_vm1, %v355_v16, %v336_v4  ;;  %v337_v26 = vadd.f32 %v599_v44, %v314_v20  ;;  %v358_v28 = vmin.f32 %v339_v18, 10.0  ;;  %299 = vst.msk [vmem:[#allocation2 + $0x28] sm:$0xff] %vm19_vm0, %v282_v22 }
  0xf4   :  { %v379_v25 = vsel %vm354_vm1, %v363_v17, %v344_v5  ;;  %v345_v27 = vadd.f32 %v599_v44, %v322_v21  ;;  %387 = vst.msk [vmem:[%s729_s3] sm:$0xff] %vm19_vm0, %v371_v24  ;;  %v366_v29 = vmin.f32 %v347_v19, 10.0  ;;  %v319_v30 = vld [vmem:[#allocation2 + $0x30] sm:$0xff]  ;;  %307 = vst.msk [vmem:[#allocation2 + $0x68] sm:$0xff] %vm19_vm0, %v290_v23 }
  0xf5   :  { %395 = vst.msk [vmem:[%s729_s3 + $0x40] sm:$0xff] %vm19_vm0, %v379_v25  ;;  %v327_v31 = vld [vmem:[#allocation2 + $0x70] sm:$0xff]  ;;  %v356_v32 = vmin.f32 %v337_v26, 10.0  ;;  %v342_v34 = vadd.f32 %v599_v44, %v319_v30  ;;  %v374_v36 = vsel %vm354_vm1, %v358_v28, %v339_v18 }
  0xf6   :  { %v364_v33 = vmin.f32 %v345_v27, 10.0  ;;  %v350_v35 = vadd.f32 %v599_v44, %v327_v31  ;;  %v382_v37 = vsel %vm354_vm1, %v366_v29, %v347_v19  ;;  %v317_v38 = vld [vmem:[#allocation2 + $0x20] sm:$0xff]  ;;  %390 = vst.msk [vmem:[%s729_s3 + $0x18] sm:$0xff] %vm19_vm0, %v374_v36 }
  0xf7   :  { %v325_v39 = vld [vmem:[#allocation2 + $0x60] sm:$0xff]  ;;  %398 = vst.msk [vmem:[%s729_s3 + $0x58] sm:$0xff] %vm19_vm0, %v382_v37  ;;  %v372_v40 = vsel %vm354_vm1, %v356_v32, %v337_v26  ;;  %v361_v42 = vmin.f32 %v342_v34, 10.0  ;;  %v340_v46 = vadd.f32 %v599_v44, %v317_v38 }
  0xf8   :  { %v380_v41 = vsel %vm354_vm1, %v364_v33, %v345_v27  ;;  %v369_v43 = vmin.f32 %v350_v35, 10.0  ;;  %388 = vst.msk [vmem:[%s729_s3 + $0x8] sm:$0xff] %vm19_vm0, %v372_v40  ;;  %v348_v47 = vadd.f32 %v599_v44, %v325_v39  ;;  %v320_v50 = vld [vmem:[#allocation2 + $0x38] sm:$0xff] }
  0xf9   :  { %396 = vst.msk [vmem:[%s729_s3 + $0x48] sm:$0xff] %vm19_vm0, %v380_v41  ;;  %v377_v48 = vsel %vm354_vm1, %v361_v42, %v342_v34  ;;  %v328_v51 = vld [vmem:[#allocation2 + $0x78] sm:$0xff]  ;;  %v359_v52 = vmin.f32 %v340_v46, 10.0  ;;  %v343_v54 = vadd.f32 %v599_v44, %v320_v50 }
  0xfa   :  { %v385_v49 = vsel %vm354_vm1, %v369_v43, %v350_v35  ;;  %393 = vst.msk [vmem:[%s729_s3 + $0x30] sm:$0xff] %vm19_vm0, %v377_v48  ;;  %v367_v53 = vmin.f32 %v348_v47, 10.0  ;;  %v351_v55 = vadd.f32 %v599_v44, %v328_v51  ;;  %v318_v56 = vld [vmem:[#allocation2 + $0x28] sm:$0xff] }
  0xfb   :  { %401 = vst.msk [vmem:[%s729_s3 + $0x70] sm:$0xff] %vm19_vm0, %v385_v49  ;;  %v326_v57 = vld [vmem:[#allocation2 + $0x68] sm:$0xff]  ;;  %v375_v58 = vsel %vm354_vm1, %v359_v52, %v340_v46  ;;  %v362_v60 = vmin.f32 %v343_v54, 10.0  ;;  %v341_v62 = vadd.f32 %v599_v44, %v318_v56 }
  0xfc   :  { %v383_v59 = vsel %vm354_vm1, %v367_v53, %v348_v47  ;;  %v370_v61 = vmin.f32 %v351_v55, 10.0  ;;  %391 = vst.msk [vmem:[%s729_s3 + $0x20] sm:$0xff] %vm19_vm0, %v375_v58  ;;  %v349_v63 = vadd.f32 %v599_v44, %v326_v57 }
  0xfd   :  { %399 = vst.msk [vmem:[%s729_s3 + $0x60] sm:$0xff] %vm19_vm0, %v383_v59  ;;  %v378_v0 = vsel %vm354_vm1, %v362_v60, %v343_v54  ;;  %v360_v2 = vmin.f32 %v341_v62, 10.0 }
  0xfe   :  { %v386_v1 = vsel %vm354_vm1, %v370_v61, %v351_v55  ;;  %394 = vst.msk [vmem:[%s729_s3 + $0x38] sm:$0xff] %vm19_vm0, %v378_v0  ;;  %v368_v3 = vmin.f32 %v349_v63, 10.0 }
  0xff   :  { %402 = vst.msk [vmem:[%s729_s3 + $0x78] sm:$0xff] %vm19_vm0, %v386_v1  ;;  %v376_v44 = vsel %vm354_vm1, %v360_v2, %v341_v62 }
 0x100   :  { %v384_v4 = vsel %vm354_vm1, %v368_v3, %v349_v63  ;;  %392 = vst.msk [vmem:[%s729_s3 + $0x28] sm:$0xff] %vm19_vm0, %v376_v44 }
 0x101   :  { %400 = vst.msk [vmem:[%s729_s3 + $0x68] sm:$0xff] %vm19_vm0, %v384_v4 }

// kernel: dim_variational_encoder.2
= control target key start
LH: loop header
LB: loop body
LE: loop exit
PB: predicated region body
PF: predicated region fallthrough
CT: control target
= control target key end

     0   :  { %vm25_vm0 = vcmask 130048   ;;  %v1112_v1 = vmov 0.0   ;;  %vm589_vm1 = vcmask 261120   ;;  %s1358_s1 = inlined_call_operand.vmem [shape: bf16[128,16], index: 1, kind: input, shape index: {}]   ;;  %s1359_s0 = inlined_call_operand.vmem [shape: bf16[128,128], index: 0, kind: input, shape index: {}]   ;;  %s1360_s2 = inlined_call_operand.vmem [shape: f32[16,32], index: 2, kind: input, shape index: {}]   ;;  %s1361_s4 = inlined_call_operand.vmem [shape: f32[32,16], index: 4, kind: input, shape index: {}]   ;;  %s1362_s3 = inlined_call_operand.vmem [shape: f32[1,32], index: 3, kind: input, shape index: {}]   ;;  %s1363_s5 = inlined_call_operand.vmem [shape: bf16[128,16], index: 5, kind: output, shape index: {}]  }
   0x1   :  { %v1096_v0 = vld [vmem:[%s1358_s1 + $0x38] sm:$0xff]   ;;  %28 = vst.msk [vmem:[#allocation2 + $0x10] sm:$0xff] %vm25_vm0, %v1112_v1  ;;  %26 = vst.msk [vmem:[#allocation2] sm:$0xff] %vm25_vm0, %v1112_v1  ;;  %v1097_v2 = vld [vmem:[%s1358_s1 + $0x30] sm:$0xff]  }
   0x2   :  { %27 = vst.msk [vmem:[#allocation2 + $0x8] sm:$0xff] %vm25_vm0, %v1112_v1  ;;  %29 = vst.msk [vmem:[#allocation2 + $0x18] sm:$0xff] %vm25_vm0, %v1112_v1  ;;  %1003 = vmatprep.subr.bf16.mxu0 %v1096_v0  ;;  %v1098_v3 = vld [vmem:[%s1358_s1 + $0x28] sm:$0xff]   ;;  %v1099_v4 = vld [vmem:[%s1358_s1 + $0x20] sm:$0xff]  }
   0x3   :  { %30 = vst.msk [vmem:[#allocation2 + $0x20] sm:$0xff] %vm25_vm0, %v1112_v1  ;;  %31 = vst.msk [vmem:[#allocation2 + $0x28] sm:$0xff] %vm25_vm0, %v1112_v1  ;;  %1004 = vmatpush3.bf16.msra.mxu0 %v1096_v0  ;;  %v1104_v5 = vld [vmem:[%s1359_s0] sm:$0xff]   ;;  %v1100_v6 = vld [vmem:[%s1358_s1 + $0x18] sm:$0xff]  }
   0x4   :  { %32 = vst.msk [vmem:[#allocation2 + $0x30] sm:$0xff] %vm25_vm0, %v1112_v1  ;;  %33 = vst.msk [vmem:[#allocation2 + $0x38] sm:$0xff] %vm25_vm0, %v1112_v1  ;;  %1005 = vmatprep.subr.bf16.mxu0 %v1097_v2  ;;  %1019 = vmatprep.mubr.bf16.mxu0 %v1104_v5  ;;  %v1101_v7 = vld [vmem:[%s1358_s1 + $0x10] sm:$0xff]   ;;  %v1102_v8 = vld [vmem:[%s1358_s1 + $0x8] sm:$0xff]  }
   0x5   :  { %34 = vst.msk [vmem:[#allocation2 + $0x40] sm:$0xff] %vm25_vm0, %v1112_v1  ;;  %35 = vst.msk [vmem:[#allocation2 + $0x48] sm:$0xff] %vm25_vm0, %v1112_v1  ;;  %v1103_v9 = vld [vmem:[%s1358_s1] sm:$0xff]   ;;  %v1105_v10 = vld [vmem:[%s1359_s0 + $0x8] sm:$0xff]  }
   0x6   :  { %36 = vst.msk [vmem:[#allocation2 + $0x50] sm:$0xff] %vm25_vm0, %v1112_v1  ;;  %37 = vst.msk [vmem:[#allocation2 + $0x58] sm:$0xff] %vm25_vm0, %v1112_v1  ;;  %v1106_v11 = vld [vmem:[%s1359_s0 + $0x10] sm:$0xff]   ;;  %v1107_v12 = vld [vmem:[%s1359_s0 + $0x18] sm:$0xff]  }
   0x7   :  { %38 = vst.msk [vmem:[#allocation2 + $0x60] sm:$0xff] %vm25_vm0, %v1112_v1  ;;  %39 = vst.msk [vmem:[#allocation2 + $0x68] sm:$0xff] %vm25_vm0, %v1112_v1  ;;  %1006 = vmatpush3.bf16.msra.mxu0 %v1097_v2  ;;  %v1108_v13 = vld [vmem:[%s1359_s0 + $0x20] sm:$0xff]   ;;  %v1109_v14 = vld [vmem:[%s1359_s0 + $0x28] sm:$0xff]  }
   0x8   :  { %40 = vst.msk [vmem:[#allocation2 + $0x70] sm:$0xff] %vm25_vm0, %v1112_v1  ;;  %41 = vst.msk [vmem:[#allocation2 + $0x78] sm:$0xff] %vm25_vm0, %v1112_v1  ;;  %1007 = vmatprep.subr.bf16.mxu0 %v1098_v3  ;;  %v1110_v15 = vld [vmem:[%s1359_s0 + $0x30] sm:$0xff]   ;;  %v1111_v16 = vld [vmem:[%s1359_s0 + $0x38] sm:$0xff]  }
   0x9   :  { %v336_v17 = vld [vmem:[%s1360_s2 + $0x8] sm:$0xff]  ;;  %v335_v18 = vld [vmem:[%s1360_s2] sm:$0xff]  ;;  %v588_v19 = vld [vmem:[%s1361_s4 + $0x18] sm:$0xff] }
   0xa   :  { %1035 = vmatprep.subr.mxu1 %v336_v17  ;;  %v60_v20 = vld [vmem:[#allocation2 + $0x10] sm:$0xff]  ;;  %v58_v22 = vld [vmem:[#allocation2] sm:$0xff]  ;;  %v61_v25 = vld [vmem:[#allocation2 + $0x18] sm:$0xff] }
   0xb   :  { %1008 = vmatpush3.bf16.msra.mxu0 %v1098_v3  ;;  %1036 = vmatpush3.msra.mxu1 %v336_v17  ;;  %v59_v28 = vld [vmem:[#allocation2 + $0x8] sm:$0xff]  ;;  %v64_v31 = vld [vmem:[#allocation2 + $0x30] sm:$0xff]  ;;  %v62_v34 = vld [vmem:[#allocation2 + $0x20] sm:$0xff] }
   0xc   :  { %1009 = vmatprep.subr.bf16.mxu0 %v1099_v4  ;;  %1037 = vmatprep.subr.mxu1 %v335_v18  ;;  %v65_v37 = vld [vmem:[#allocation2 + $0x38] sm:$0xff]  ;;  %v63_v41 = vld [vmem:[#allocation2 + $0x28] sm:$0xff]  ;;  %v66_v48 = vld [vmem:[#allocation2 + $0x40] sm:$0xff] }
   0xd   :  { %1038 = vmatpush3.msra.mxu1 %v335_v18  ;;  %v68_v44 = vld [vmem:[#allocation2 + $0x50] sm:$0xff]  ;;  %v69_v53 = vld [vmem:[#allocation2 + $0x58] sm:$0xff]  ;;  %v586_v54 = vld [vmem:[%s1361_s4 + $0x8] sm:$0xff] }
   0xe   :  { %1063 = vmatprep.subr.mxu1 %v588_v19  ;;  %v587_v49 = vld [vmem:[%s1361_s4 + $0x10] sm:$0xff]  ;;  %v67_v58 = vld [vmem:[#allocation2 + $0x48] sm:$0xff]  ;;  %v70_v2 = vld [vmem:[#allocation2 + $0x60] sm:$0xff] }
   0xf   :  { %1010 = vmatpush3.bf16.msra.mxu0 %v1099_v4  ;;  %v72_v62 = vld [vmem:[#allocation2 + $0x70] sm:$0xff] }
  0x10   :  { %1011 = vmatprep.subr.bf16.mxu0 %v1100_v6 }
  0x13   :  { %1012 = vmatpush3.bf16.msra.mxu0 %v1100_v6  ;;  %v73_v6 = vld [vmem:[#allocation2 + $0x78] sm:$0xff] }
  0x14   :  { %1013 = vmatprep.subr.bf16.mxu0 %v1101_v7 }
  0x17   :  { %1014 = vmatpush3.bf16.msra.mxu0 %v1101_v7 }
  0x18   :  { %1015 = vmatprep.subr.bf16.mxu0 %v1102_v8 }
  0x1b   :  { %1016 = vmatpush3.bf16.msra.mxu0 %v1102_v8 }
  0x1c   :  { %1017 = vmatprep.subr.bf16.mxu0 %v1103_v9 }
  0x1f   :  { %1018 = vmatpush3.bf16.msra.mxu0 %v1103_v9 }
  0x22   :  { %1020 = vmatmul.mubr.bf16.vlgmr.msra.gmra.mxu0 %v1105_v10  ;;  %v71_v10 = vld [vmem:[#allocation2 + $0x68] sm:$0xff] }
  0x23   :  { %1023 = vmatprep.mubr.bf16.mxu0 %v1106_v11 }
  0x2a   :  { %1024 = vmatmul.mubr.bf16.gmra.mxu0 %v1107_v12 }
  0x2b   :  { %1027 = vmatprep.mubr.bf16.mxu0 %v1108_v13 }
  0x32   :  { %1028 = vmatmul.mubr.bf16.gmra.mxu0 %v1109_v14 }
  0x33   :  { %1031 = vmatprep.mubr.bf16.mxu0 %v1110_v15 }
  0x3a   :  { %1032 = vmatmul.mubr.bf16.gmra.mxu0 %v1111_v16 }
  0xe2   :  { %v1021_v21 = vpop.f32.mrf.mxu0 }
  0xe3   :  { %v285_v23 = vadd.f32 %v1021_v21, %v60_v20 }
  0xe4   :  { %v220_v24 = vpop.f32.mrf.mxu0 }
  0xe5   :  { %302 = vst.msk [vmem:[#allocation2 + $0x10] sm:$0xff] %vm25_vm0, %v285_v23  ;;  %v283_v26 = vadd.f32 %v220_v24, %v58_v22  ;;  %v585_v22 = vld [vmem:[%s1361_s4] sm:$0xff] }
  0xe6   :  { %v1022_v27 = vpop.f32.mrf.mxu0  ;;  %v1260_v23 = vld [vmem:[%s1362_s3] ss:$0 sm:$0xff] }
  0xe7   :  { %300 = vst.msk [vmem:[#allocation2] sm:$0xff] %vm25_vm0, %v283_v26  ;;  %v286_v29 = vadd.f32 %v1022_v27, %v61_v25 }
  0xe8   :  { %v223_v30 = vpop.f32.mrf.mxu0 }
  0xe9   :  { %303 = vst.msk [vmem:[#allocation2 + $0x18] sm:$0xff] %vm25_vm0, %v286_v29  ;;  %v284_v32 = vadd.f32 %v223_v30, %v59_v28 }
  0xea   :  { %v1025_v33 = vpop.f32.mrf.mxu0 }
  0xeb   :  { %301 = vst.msk [vmem:[#allocation2 + $0x8] sm:$0xff] %vm25_vm0, %v284_v32  ;;  %v289_v35 = vadd.f32 %v1025_v33, %v64_v31 }
  0xec   :  { %v236_v36 = vpop.f32.mrf.mxu0  ;;  %v321_v51 = vld [vmem:[#allocation2 + $0x10] sm:$0xff] }
  0xed   :  { %306 = vst.msk [vmem:[#allocation2 + $0x30] sm:$0xff] %vm25_vm0, %v289_v35  ;;  %v287_v38 = vadd.f32 %v236_v36, %v62_v34 }
  0xee   :  { %v1026_v39 = vpop.f32.mrf.mxu0  ;;  %v319_v40 = vld [vmem:[#allocation2] sm:$0xff] }
  0xef   :  { %304 = vst.msk [vmem:[#allocation2 + $0x20] sm:$0xff] %vm25_vm0, %v287_v38  ;;  %v290_v42 = vadd.f32 %v1026_v39, %v65_v37  ;;  %1039 = vmatprep.mubr.msk.f32.mxu1 %vm25_vm0, %v319_v40 }
  0xf0   :  { %v239_v43 = vpop.f32.mrf.mxu0  ;;  %v322_v57 = vld [vmem:[#allocation2 + $0x18] sm:$0xff] }
  0xf1   :  { %307 = vst.msk [vmem:[#allocation2 + $0x38] sm:$0xff] %vm25_vm0, %v290_v42  ;;  %v288_v45 = vadd.f32 %v239_v43, %v63_v41 }
  0xf2   :  { %v1029_v46 = vpop.f32.mrf.mxu0  ;;  %v320_v47 = vld [vmem:[#allocation2 + $0x8] sm:$0xff] }
  0xf3   :  { %305 = vst.msk [vmem:[#allocation2 + $0x28] sm:$0xff] %vm25_vm0, %v288_v45  ;;  %v293_v50 = vadd.f32 %v1029_v46, %v68_v44  ;;  %1040 = vmatmul.mubr.msk.f32.vlgmr.msra.gmra.mxu1 %vm25_vm0, %v320_v47 }
  0xf4   :  { %v252_v52 = vpop.f32.mrf.mxu0  ;;  %1042 = vmatprep.mubr.msk.f32.mxu1 %vm25_vm0, %v321_v51  ;;  %1064 = vmatpush3.msra.mxu1 %v588_v19  ;;  %v325_v4 = vld [vmem:[#allocation2 + $0x30] sm:$0xff] }
  0xf5   :  { %310 = vst.msk [vmem:[#allocation2 + $0x50] sm:$0xff] %vm25_vm0, %v293_v50  ;;  %v291_v55 = vadd.f32 %v252_v52, %v66_v48  ;;  %1065 = vmatprep.subr.mxu1 %v587_v49 }
  0xf6   :  { %v1030_v56 = vpop.f32.mrf.mxu0  ;;  %v323_v59 = vld [vmem:[#allocation2 + $0x20] sm:$0xff]  ;;  %1066 = vmatpush3.msra.mxu1 %v587_v49 }
  0xf7   :  { %308 = vst.msk [vmem:[#allocation2 + $0x40] sm:$0xff] %vm25_vm0, %v291_v55  ;;  %v294_v60 = vadd.f32 %v1030_v56, %v69_v53  ;;  %1043 = vmatmul.mubr.msk.f32.gmra.mxu1 %vm25_vm0, %v322_v57  ;;  %1067 = vmatprep.subr.mxu1 %v586_v54 }
  0xf8   :  { %v255_v61 = vpop.f32.mrf.mxu0  ;;  %1045 = vmatprep.mubr.msk.f32.mxu1 %vm25_vm0, %v323_v59  ;;  %1068 = vmatpush3.msra.mxu1 %v586_v54  ;;  %v326_v9 = vld [vmem:[#allocation2 + $0x38] sm:$0xff] }
  0xf9   :  { %311 = vst.msk [vmem:[#allocation2 + $0x58] sm:$0xff] %vm25_vm0, %v294_v60  ;;  %v292_v63 = vadd.f32 %v255_v61, %v67_v58  ;;  %1069 = vmatprep.subr.mxu1 %v585_v22 }
  0xfa   :  { %v1033_v0 = vpop.f32.mrf.mxu0  ;;  %v324_v1 = vld [vmem:[#allocation2 + $0x28] sm:$0xff]  ;;  %1070 = vmatpush3.msra.mxu1 %v585_v22 }
  0xfb   :  { %309 = vst.msk [vmem:[#allocation2 + $0x48] sm:$0xff] %vm25_vm0, %v292_v63  ;;  %v297_v3 = vadd.f32 %v1033_v0, %v72_v62  ;;  %1046 = vmatmul.mubr.msk.f32.gmra.mxu1 %vm25_vm0, %v324_v1 }
  0xfc   :  { %v268_v5 = vpop.f32.mrf.mxu0  ;;  %1048 = vmatprep.mubr.msk.f32.mxu1 %vm25_vm0, %v325_v4  ;;  %v329_v16 = vld [vmem:[#allocation2 + $0x50] sm:$0xff] }
  0xfd   :  { %314 = vst.msk [vmem:[#allocation2 + $0x70] sm:$0xff] %vm25_vm0, %v297_v3  ;;  %v295_v7 = vadd.f32 %v268_v5, %v70_v2 }
  0xfe   :  { %v1034_v8 = vpop.f32.mrf.mxu0  ;;  %v327_v11 = vld [vmem:[#allocation2 + $0x40] sm:$0xff] }
  0xff   :  { %312 = vst.msk [vmem:[#allocation2 + $0x60] sm:$0xff] %vm25_vm0, %v295_v7  ;;  %v298_v12 = vadd.f32 %v1034_v8, %v73_v6  ;;  %1049 = vmatmul.mubr.msk.f32.gmra.mxu1 %vm25_vm0, %v326_v9 }
 0x100   :  { %v271_v13 = vpop.f32.mrf.mxu0  ;;  %1051 = vmatprep.mubr.msk.f32.mxu1 %vm25_vm0, %v327_v11  ;;  %v330_v17 = vld [vmem:[#allocation2 + $0x58] sm:$0xff] }
 0x101   :  { %315 = vst.msk [vmem:[#allocation2 + $0x78] sm:$0xff] %vm25_vm0, %v298_v12  ;;  %v296_v14 = vadd.f32 %v271_v13, %v71_v10 }
 0x102   :  { %v328_v15 = vld [vmem:[#allocation2 + $0x48] sm:$0xff] }
 0x103   :  { %313 = vst.msk [vmem:[#allocation2 + $0x68] sm:$0xff] %vm25_vm0, %v296_v14  ;;  %1052 = vmatmul.mubr.msk.f32.gmra.mxu1 %vm25_vm0, %v328_v15 }
 0x104   :  { %1054 = vmatprep.mubr.msk.f32.mxu1 %vm25_vm0, %v329_v16  ;;  %v333_v20 = vld [vmem:[#allocation2 + $0x70] sm:$0xff] }
 0x106   :  { %v331_v18 = vld [vmem:[#allocation2 + $0x60] sm:$0xff] }
 0x107   :  { %1055 = vmatmul.mubr.msk.f32.gmra.mxu1 %vm25_vm0, %v330_v17 }
 0x108   :  { %1057 = vmatprep.mubr.msk.f32.mxu1 %vm25_vm0, %v331_v18  ;;  %v334_v21 = vld [vmem:[#allocation2 + $0x78] sm:$0xff] }
 0x10a   :  { %v332_v19 = vld [vmem:[#allocation2 + $0x68] sm:$0xff] }
 0x10b   :  { %1058 = vmatmul.mubr.msk.f32.gmra.mxu1 %vm25_vm0, %v332_v19 }
 0x10c   :  { %1060 = vmatprep.mubr.msk.f32.mxu1 %vm25_vm0, %v333_v20 }
 0x10f   :  { %1061 = vmatmul.mubr.msk.f32.gmra.mxu1 %vm25_vm0, %v334_v21 }
 0x1b3   :  { %v1041_v24 = vpop.f32.mrf.mxu1 }
 0x1b4   :  { %v464_v25 = vadd.f32 %v1041_v24, %v1260_v23 }
 0x1b5   :  { %v458_v26 = vpop.f32.mrf.mxu1 }
 0x1b6   :  { %v459_v27 = vadd.f32 %v1260_v23, %v458_v26  ;;  %v554_v28 = vmul.f32 0.01, %v464_v25  ;;  %vm538_vm2 = vcmp.gt.f32.partialorder %v464_v25, 0.0 }
 0x1b7   :  { %v1044_v29 = vpop.f32.mrf.mxu1 }
 0x1b8   :  { %vm537_vm3 = vcmp.gt.f32.partialorder %v459_v27, 0.0  ;;  %v553_v30 = vmul.f32 0.01, %v459_v27  ;;  %v474_v31 = vadd.f32 %v1044_v29, %v1260_v23  ;;  %v570_v35 = vsel %vm538_vm2, %v464_v25, %v554_v28 }
 0x1b9   :  { %v468_v32 = vpop.f32.mrf.mxu1 }
 0x1ba   :  { %v469_v33 = vadd.f32 %v1260_v23, %v468_v32  ;;  %v569_v34 = vsel %vm537_vm3, %v459_v27, %v553_v30  ;;  %v556_v36 = vmul.f32 0.01, %v474_v31  ;;  %vm540_vm4 = vcmp.gt.f32.partialorder %v474_v31, 0.0 }
 0x1bb   :  { %v1047_v37 = vpop.f32.mrf.mxu1  ;;  %1071 = vmatprep.mubr.msk.f32.mxu1 %vm589_vm1, %v569_v34  ;;  %vm847_vm3 = vcmask 125952  }
 0x1bc   :  { %vm539_vm5 = vcmp.gt.f32.partialorder %v469_v33, 0.0  ;;  %v555_v38 = vmul.f32 0.01, %v469_v33  ;;  %v484_v39 = vadd.f32 %v1047_v37, %v1260_v23  ;;  %1072 = vmatmul.mubr.msk.f32.vlgmr.msra.gmra.mxu1 %vm589_vm1, %v570_v35  ;;  %v572_v45 = vsel %vm540_vm4, %v474_v31, %v556_v36 }
 0x1bd   :  { %v478_v40 = vpop.f32.mrf.mxu1 }
 0x1be   :  { %v479_v41 = vadd.f32 %v1260_v23, %v478_v40  ;;  %v571_v42 = vsel %vm539_vm5, %v469_v33, %v555_v38  ;;  %v558_v43 = vmul.f32 0.01, %v484_v39  ;;  %vm542_vm6 = vcmp.gt.f32.partialorder %v484_v39, 0.0 }
 0x1bf   :  { %v1050_v44 = vpop.f32.mrf.mxu1  ;;  %1074 = vmatprep.mubr.msk.f32.mxu1 %vm589_vm1, %v571_v42 }
 0x1c0   :  { %vm541_vm7 = vcmp.gt.f32.partialorder %v479_v41, 0.0  ;;  %v557_v46 = vmul.f32 0.01, %v479_v41  ;;  %v494_v47 = vadd.f32 %v1050_v44, %v1260_v23  ;;  %1075 = vmatmul.mubr.msk.f32.gmra.mxu1 %vm589_vm1, %v572_v45  ;;  %v574_v53 = vsel %vm542_vm6, %v484_v39, %v558_v43 }
 0x1c1   :  { %v488_v48 = vpop.f32.mrf.mxu1 }
 0x1c2   :  { %v489_v49 = vadd.f32 %v1260_v23, %v488_v48  ;;  %v573_v50 = vsel %vm541_vm7, %v479_v41, %v557_v46  ;;  %v560_v51 = vmul.f32 0.01, %v494_v47  ;;  %vm544_vm8 = vcmp.gt.f32.partialorder %v494_v47, 0.0 }
 0x1c3   :  { %v1053_v52 = vpop.f32.mrf.mxu1  ;;  %1077 = vmatprep.mubr.msk.f32.mxu1 %vm589_vm1, %v573_v50 }
 0x1c4   :  { %vm543_vm9 = vcmp.gt.f32.partialorder %v489_v49, 0.0  ;;  %v559_v54 = vmul.f32 0.01, %v489_v49  ;;  %v504_v55 = vadd.f32 %v1053_v52, %v1260_v23  ;;  %1078 = vmatmul.mubr.msk.f32.gmra.mxu1 %vm589_vm1, %v574_v53  ;;  %v576_v61 = vsel %vm544_vm8, %v494_v47, %v560_v51 }
 0x1c5   :  { %v498_v56 = vpop.f32.mrf.mxu1 }
 0x1c6   :  { %v499_v57 = vadd.f32 %v1260_v23, %v498_v56  ;;  %v575_v58 = vsel %vm543_vm9, %v489_v49, %v559_v54  ;;  %v562_v59 = vmul.f32 0.01, %v504_v55  ;;  %vm546_vm10 = vcmp.gt.f32.partialorder %v504_v55, 0.0 }
 0x1c7   :  { %v1056_v60 = vpop.f32.mrf.mxu1  ;;  %1080 = vmatprep.mubr.msk.f32.mxu1 %vm589_vm1, %v575_v58 }
 0x1c8   :  { %vm545_vm11 = vcmp.gt.f32.partialorder %v499_v57, 0.0  ;;  %v561_v62 = vmul.f32 0.01, %v499_v57  ;;  %v514_v63 = vadd.f32 %v1056_v60, %v1260_v23  ;;  %1081 = vmatmul.mubr.msk.f32.gmra.mxu1 %vm589_vm1, %v576_v61  ;;  %v578_v5 = vsel %vm546_vm10, %v504_v55, %v562_v59 }
 0x1c9   :  { %v508_v0 = vpop.f32.mrf.mxu1 }
 0x1ca   :  { %v509_v1 = vadd.f32 %v1260_v23, %v508_v0  ;;  %v577_v2 = vsel %vm545_vm11, %v499_v57, %v561_v62  ;;  %v564_v3 = vmul.f32 0.01, %v514_v63  ;;  %vm548_vm12 = vcmp.gt.f32.partialorder %v514_v63, 0.0 }
 0x1cb   :  { %v1059_v4 = vpop.f32.mrf.mxu1  ;;  %1083 = vmatprep.mubr.msk.f32.mxu1 %vm589_vm1, %v577_v2 }
 0x1cc   :  { %vm547_vm13 = vcmp.gt.f32.partialorder %v509_v1, 0.0  ;;  %v563_v6 = vmul.f32 0.01, %v509_v1  ;;  %v524_v7 = vadd.f32 %v1059_v4, %v1260_v23  ;;  %1084 = vmatmul.mubr.msk.f32.gmra.mxu1 %vm589_vm1, %v578_v5  ;;  %v580_v13 = vsel %vm548_vm12, %v514_v63, %v564_v3 }
 0x1cd   :  { %v518_v8 = vpop.f32.mrf.mxu1 }
 0x1ce   :  { %v519_v9 = vadd.f32 %v1260_v23, %v518_v8  ;;  %v579_v10 = vsel %vm547_vm13, %v509_v1, %v563_v6  ;;  %v566_v11 = vmul.f32 0.01, %v524_v7  ;;  %vm550_vm14 = vcmp.gt.f32.partialorder %v524_v7, 0.0 }
 0x1cf   :  { %v1062_v12 = vpop.f32.mrf.mxu1  ;;  %1086 = vmatprep.mubr.msk.f32.mxu1 %vm589_vm1, %v579_v10 }
 0x1d0   :  { %vm549_vm15 = vcmp.gt.f32.partialorder %v519_v9, 0.0  ;;  %v565_v14 = vmul.f32 0.01, %v519_v9  ;;  %v534_v15 = vadd.f32 %v1062_v12, %v1260_v23  ;;  %1087 = vmatmul.mubr.msk.f32.gmra.mxu1 %vm589_vm1, %v580_v13  ;;  %v582_v20 = vsel %vm550_vm14, %v524_v7, %v566_v11 }
 0x1d1   :  { %v528_v16 = vpop.f32.mrf.mxu1 }
 0x1d2   :  { %v529_v17 = vadd.f32 %v1260_v23, %v528_v16  ;;  %v581_v18 = vsel %vm549_vm15, %v519_v9, %v565_v14  ;;  %v568_v19 = vmul.f32 0.01, %v534_v15  ;;  %vm552_vm0 = vcmp.gt.f32.partialorder %v534_v15, 0.0 }
 0x1d3   :  { %1089 = vmatprep.mubr.msk.f32.mxu1 %vm589_vm1, %v581_v18 }
 0x1d4   :  { %vm551_vm2 = vcmp.gt.f32.partialorder %v529_v17, 0.0  ;;  %v567_v21 = vmul.f32 0.01, %v529_v17  ;;  %1090 = vmatmul.mubr.msk.f32.gmra.mxu1 %vm589_vm1, %v582_v20  ;;  %v584_v24 = vsel %vm552_vm0, %v534_v15, %v568_v19 }
 0x1d6   :  { %v583_v22 = vsel %vm551_vm2, %v529_v17, %v567_v21 }
 0x1d7   :  { %1092 = vmatprep.mubr.msk.f32.mxu1 %vm589_vm1, %v583_v22 }
 0x1d8   :  { %1093 = vmatmul.mubr.msk.f32.gmra.mxu1 %vm589_vm1, %v584_v24 }
 0x27c   :  { %v1073_v25 = vpop.f32.mrf.mxu1 }
 0x27d   :  { %v934_v26 = vpack.c.bf16 %v1073_v25, %v1073_v25 }
 0x27e   :  { %v704_v23 = vpop.f32.mrf.mxu1 }
 0x27f   :  { %849 = vst.msk [vmem:[%s1363_s5 + $0x4] sm:$0xf] %vm847_vm3, %v934_v26  ;;  %v933_v27 = vpack.c.bf16 %v704_v23, %v704_v23 }
 0x280   :  { %v1076_v28 = vpop.f32.mrf.mxu1 }
 0x281   :  { %848 = vst.msk [vmem:[%s1363_s5] sm:$0xf] %vm847_vm3, %v933_v27  ;;  %v936_v29 = vpack.c.bf16 %v1076_v28, %v1076_v28 }
 0x282   :  { %v714_v30 = vpop.f32.mrf.mxu1 }
 0x283   :  { %851 = vst.msk [vmem:[%s1363_s5 + $0xc] sm:$0xf] %vm847_vm3, %v936_v29  ;;  %v935_v31 = vpack.c.bf16 %v714_v30, %v714_v30 }
 0x284   :  { %v1079_v32 = vpop.f32.mrf.mxu1 }
 0x285   :  { %850 = vst.msk [vmem:[%s1363_s5 + $0x8] sm:$0xf] %vm847_vm3, %v935_v31  ;;  %v938_v33 = vpack.c.bf16 %v1079_v32, %v1079_v32 }
 0x286   :  { %v724_v34 = vpop.f32.mrf.mxu1 }
 0x287   :  { %853 = vst.msk [vmem:[%s1363_s5 + $0x14] sm:$0xf] %vm847_vm3, %v938_v33  ;;  %v937_v35 = vpack.c.bf16 %v724_v34, %v724_v34 }
 0x288   :  { %v1082_v36 = vpop.f32.mrf.mxu1 }
 0x289   :  { %852 = vst.msk [vmem:[%s1363_s5 + $0x10] sm:$0xf] %vm847_vm3, %v937_v35  ;;  %v940_v37 = vpack.c.bf16 %v1082_v36, %v1082_v36 }
 0x28a   :  { %v734_v38 = vpop.f32.mrf.mxu1 }
 0x28b   :  { %855 = vst.msk [vmem:[%s1363_s5 + $0x1c] sm:$0xf] %vm847_vm3, %v940_v37  ;;  %v939_v39 = vpack.c.bf16 %v734_v38, %v734_v38 }
 0x28c   :  { %v1085_v40 = vpop.f32.mrf.mxu1 }
 0x28d   :  { %854 = vst.msk [vmem:[%s1363_s5 + $0x18] sm:$0xf] %vm847_vm3, %v939_v39  ;;  %v942_v41 = vpack.c.bf16 %v1085_v40, %v1085_v40 }
 0x28e   :  { %v744_v42 = vpop.f32.mrf.mxu1 }
 0x28f   :  { %857 = vst.msk [vmem:[%s1363_s5 + $0x24] sm:$0xf] %vm847_vm3, %v942_v41  ;;  %v941_v43 = vpack.c.bf16 %v744_v42, %v744_v42 }
 0x290   :  { %v1088_v44 = vpop.f32.mrf.mxu1 }
 0x291   :  { %856 = vst.msk [vmem:[%s1363_s5 + $0x20] sm:$0xf] %vm847_vm3, %v941_v43  ;;  %v944_v45 = vpack.c.bf16 %v1088_v44, %v1088_v44 }
 0x292   :  { %v754_v46 = vpop.f32.mrf.mxu1 }
 0x293   :  { %859 = vst.msk [vmem:[%s1363_s5 + $0x2c] sm:$0xf] %vm847_vm3, %v944_v45  ;;  %v943_v47 = vpack.c.bf16 %v754_v46, %v754_v46 }
 0x294   :  { %v1091_v48 = vpop.f32.mrf.mxu1 }
 0x295   :  { %858 = vst.msk [vmem:[%s1363_s5 + $0x28] sm:$0xf] %vm847_vm3, %v943_v47  ;;  %v946_v49 = vpack.c.bf16 %v1091_v48, %v1091_v48 }
 0x296   :  { %v764_v50 = vpop.f32.mrf.mxu1 }
 0x297   :  { %861 = vst.msk [vmem:[%s1363_s5 + $0x34] sm:$0xf] %vm847_vm3, %v946_v49  ;;  %v945_v51 = vpack.c.bf16 %v764_v50, %v764_v50 }
 0x298   :  { %v1094_v52 = vpop.f32.mrf.mxu1 }
 0x299   :  { %860 = vst.msk [vmem:[%s1363_s5 + $0x30] sm:$0xf] %vm847_vm3, %v945_v51  ;;  %v948_v53 = vpack.c.bf16 %v1094_v52, %v1094_v52 }
 0x29a   :  { %v774_v54 = vpop.f32.mrf.mxu1 }
 0x29b   :  { %863 = vst.msk [vmem:[%s1363_s5 + $0x3c] sm:$0xf] %vm847_vm3, %v948_v53  ;;  %v947_v55 = vpack.c.bf16 %v774_v54, %v774_v54 }
 0x29d   :  { %862 = vst.msk [vmem:[%s1363_s5 + $0x38] sm:$0xf] %vm847_vm3, %v947_v55 }

</bundles_post_ra>
